<compile_context>
chip_gen: v7x
topology: tpu7x:2x2x1
jax: 0.10.0
libtpu: 0.0.40
codegen_flags: <defaults>
</compile_context>

<pallas_src>
import jax
import jax.numpy as jnp
from jax.experimental import pallas as pl
from jax.experimental.pallas import tpu as pltpu

NUM_FEATURES = 8   # stand-in for len(df.columns) - 1 (dataframe not available)
HIDDEN = 10
NUM_CLASSES = 5
NEG_INF = -1e30    # finite "-inf" for padded logit columns


def _round_up(n, m):
    return ((n + m - 1) // m) * m


def netsmall_kernel(x_ref, w1_ref, b1_ref, w2_ref, b2_ref, o_ref):
    """One batch tile: softmax(relu(x @ W1p + b1p) @ W2p + b2p) over 8 padded class lanes."""
    x = x_ref[...]                                                      # (TB, F) f32
    # fc1 + relu (hidden padded to 16; padded columns are exactly 0 after relu)
    h = jnp.dot(x, w1_ref[...], preferred_element_type=jnp.float32) + b1_ref[...]
    h = jnp.maximum(h, 0.0)
    # fc2 — padded class columns get logit -1e30 (zero weights + -1e30 bias)
    logits = jnp.dot(h, w2_ref[...], preferred_element_type=jnp.float32) + b2_ref[...]
    # softmax over the (8-lane) class axis; padded columns underflow to prob 0
    m = jnp.max(logits, axis=1, keepdims=True)
    e = jnp.exp(logits - m)
    denom = jnp.sum(e, axis=1, keepdims=True)
    o_ref[...] = e * pl.reciprocal(denom, approx=False)


def netsmall_forward(x, w1, b1, w2, b2, *, tb_max=8192):
    """x: (B, F) f32; w1: (F, H); b1: (1, H); w2: (H, C); b2: (1, C) -> (B, C) probs."""
    B, F = x.shape
    H = w1.shape[1]
    C = w2.shape[1]

    HP = _round_up(H, 8)           # 10 -> 16: sublane-aligned hidden dim
    CP = _round_up(C, 8)           # 5  -> 8 : narrow, masked-but-cheap output stores

    # One-time parameter padding (few hundred bytes; resident in VMEM).
    w1p = jnp.zeros((F, HP), jnp.float32).at[:, :H].set(w1)
    b1p = jnp.zeros((1, HP), jnp.float32).at[:, :H].set(b1)
    w2p = jnp.zeros((HP, CP), jnp.float32).at[:H, :C].set(w2)
    b2p = jnp.full((1, CP), NEG_INF, jnp.float32).at[:, :C].set(b2)

    # Batch tile: multiple of 8, capped so there are >= 2 grid steps when B > 8
    # (megacore on v7x), and capped at tb_max for VMEM.  An (tb, 8) f32 tile is
    # stored lane-padded (tb*128*4 B), so tb=8192 -> ~4 MiB/buffer; double-
    # buffered input + output ~16 MiB, covered by vmem_limit_bytes below.
    half = (B + 1) // 2
    tb = min(tb_max, max(8, _round_up(half, 8)))
    grid = (pl.cdiv(B, tb),)       # ragged last block handled by Pallas write masking

    cost = pl.CostEstimate(
        flops=2 * B * (F * HP + HP * CP),
        transcendentals=B * CP,
        bytes_accessed=B * (F + CP) * 4,
    )

    out = pl.pallas_call(
        netsmall_kernel,
        out_shape=jax.ShapeDtypeStruct((B, CP), jnp.float32),
        grid=grid,
        in_specs=[
            pl.BlockSpec((tb, F), lambda i: (i, 0)),      # x streamed over batch
            pl.BlockSpec((F, HP), lambda i: (0, 0)),      # resident params (constant maps)
            pl.BlockSpec((1, HP), lambda i: (0, 0)),
            pl.BlockSpec((HP, CP), lambda i: (0, 0)),
            pl.BlockSpec((1, CP), lambda i: (0, 0)),
        ],
        out_specs=pl.BlockSpec((tb, CP), lambda i: (i, 0)),
        compiler_params=pltpu.CompilerParams(
            dimension_semantics=("parallel",),            # megacore sharding on v7x
            vmem_limit_bytes=32 * 1024 * 1024,            # room for tb up to 8192
        ),
        cost_estimate=cost,
    )(x, w1p, b1p, w2p, b2p)

    return out[:, :C]


def init_params(key):
    """Deterministic init mimicking nn.Linear default: U(-1/sqrt(fan_in), 1/sqrt(fan_in))."""
    k1, k2, k3, k4 = jax.random.split(key, 4)
    bound1 = 1.0 / jnp.sqrt(NUM_FEATURES)
    bound2 = 1.0 / jnp.sqrt(HIDDEN)
    # Stored pre-transposed relative to PyTorch's (out, in) convention.
    w1 = jax.random.uniform(k1, (NUM_FEATURES, HIDDEN), jnp.float32, -bound1, bound1)
    b1 = jax.random.uniform(k2, (1, HIDDEN), jnp.float32, -bound1, bound1)
    w2 = jax.random.uniform(k3, (HIDDEN, NUM_CLASSES), jnp.float32, -bound2, bound2)
    b2 = jax.random.uniform(k4, (1, NUM_CLASSES), jnp.float32, -bound2, bound2)
    return w1, b1, w2, b2


def reference_forward(x, w1, b1, w2, b2):
    h = jnp.maximum(x @ w1 + b1, 0.0)
    logits = h @ w2 + b2
    return jax.nn.softmax(logits, axis=1)


if __name__ == "__main__":
    key = jax.random.PRNGKey(0)
    kx, kp = jax.random.split(key)
    w1, b1, w2, b2 = init_params(kp)

    # 1) Small-shape check (single grid step).
    batch = 8
    x = jax.random.normal(kx, (batch, NUM_FEATURES), jnp.float32)
    out = jax.block_until_ready(netsmall_forward(x, w1, b1, w2, b2))
    ref = reference_forward(x, w1, b1, w2, b2)
    assert out.shape == (batch, NUM_CLASSES)
    assert jnp.allclose(out, ref, atol=1e-5, rtol=1e-5)
    assert jnp.allclose(jnp.sum(out, axis=1), 1.0, atol=1e-5)

    # 2) Multi-step grid with a ragged last block (20 rows, tb=8 -> grid=3, last block 4 valid rows).
    batch2 = 20
    x2 = jax.random.normal(jax.random.PRNGKey(1), (batch2, NUM_FEATURES), jnp.float32)
    out2 = jax.block_until_ready(netsmall_forward(x2, w1, b1, w2, b2, tb_max=8))
    ref2 = reference_forward(x2, w1, b1, w2, b2)
    assert out2.shape == (batch2, NUM_CLASSES)
    assert jnp.allclose(out2, ref2, atol=1e-5, rtol=1e-5)

    # 3) Default tiling path: tb = round_up(ceil(B/2), 8) -> 2 grid steps, ragged tail.
    batch3 = 200
    x3 = jax.random.normal(jax.random.PRNGKey(2), (batch3, NUM_FEATURES), jnp.float32)
    out3 = jax.block_until_ready(netsmall_forward(x3, w1, b1, w2, b2))
    ref3 = reference_forward(x3, w1, b1, w2, b2)
    assert out3.shape == (batch3, NUM_CLASSES)
    assert jnp.allclose(out3, ref3, atol=1e-5, rtol=1e-5)

    print("KERNEL_OK")
</pallas_src>

<mosaic_0001>
module attributes {stable_mosaic.version = 11 : i64} {
  func.func @netsmall_kernel(%arg0: i32, %arg1: memref<8x8xf32, #tpu.memory_space<vmem>>, %arg2: memref<8x16xf32, #tpu.memory_space<vmem>>, %arg3: memref<1x16xf32, #tpu.memory_space<vmem>>, %arg4: memref<16x8xf32, #tpu.memory_space<vmem>>, %arg5: memref<1x8xf32, #tpu.memory_space<vmem>>, %arg6: memref<8x8xf32, #tpu.memory_space<vmem>>) attributes {dimension_semantics = [#tpu.dimension_semantics<parallel>], iteration_bounds = array<i64: 1>, scalar_prefetch = 0 : i64, scratch_operands = 0 : i64, tpu.core_type = #tpu.core_type<tc>, window_params = [{transform_indices = @transform_0, window_bounds = array<i64: 8, 8>}, {pipeline_mode = #tpu.pipeline_mode<synchronous>, transform_indices = @transform_1, window_bounds = array<i64: 8, 16>}, {pipeline_mode = #tpu.pipeline_mode<synchronous>, transform_indices = @transform_2, window_bounds = array<i64: 1, 16>}, {pipeline_mode = #tpu.pipeline_mode<synchronous>, transform_indices = @transform_3, window_bounds = array<i64: 16, 8>}, {pipeline_mode = #tpu.pipeline_mode<synchronous>, transform_indices = @transform_4, window_bounds = array<i64: 1, 8>}, {transform_indices = @transform_5, window_bounds = array<i64: 8, 8>}]} {
    %c0 = arith.constant 0 : index
    %c0_0 = arith.constant 0 : index
    %0 = vector.load %arg1[%c0, %c0_0] : memref<8x8xf32, #tpu.memory_space<vmem>>, vector<8x8xf32>
    %c0_1 = arith.constant 0 : index
    %c0_2 = arith.constant 0 : index
    %1 = vector.load %arg2[%c0_1, %c0_2] : memref<8x16xf32, #tpu.memory_space<vmem>>, vector<8x16xf32>
    %cst = arith.constant dense<0.000000e+00> : vector<8x16xf32>
    %2 = tpu.matmul %0, %1, %cst {dimension_numbers = #tpu.dot_dimension_numbers<[1], [0], [0], [1], [0, 0, 1, 1], [], []>} : vector<8x8xf32>, vector<8x16xf32>, vector<8x16xf32> -> vector<8x16xf32>
    %c0_3 = arith.constant 0 : index
    %c0_4 = arith.constant 0 : index
    %3 = vector.load %arg3[%c0_3, %c0_4] : memref<1x16xf32, #tpu.memory_space<vmem>>, vector<1x16xf32>
    %4 = vector.broadcast %3 : vector<1x16xf32> to vector<8x16xf32>
    %5 = arith.addf %2, %4 : vector<8x16xf32>
    %cst_5 = arith.constant 0.000000e+00 : f32
    %6 = vector.broadcast %cst_5 : f32 to vector<8x16xf32>
    %7 = arith.maximumf %5, %6 : vector<8x16xf32>
    %c0_6 = arith.constant 0 : index
    %c0_7 = arith.constant 0 : index
    %8 = vector.load %arg4[%c0_6, %c0_7] : memref<16x8xf32, #tpu.memory_space<vmem>>, vector<16x8xf32>
    %cst_8 = arith.constant dense<0.000000e+00> : vector<8x8xf32>
    %9 = tpu.matmul %7, %8, %cst_8 {dimension_numbers = #tpu.dot_dimension_numbers<[1], [0], [0], [1], [0, 0, 1, 1], [], []>} : vector<8x16xf32>, vector<16x8xf32>, vector<8x8xf32> -> vector<8x8xf32>
    %c0_9 = arith.constant 0 : index
    %c0_10 = arith.constant 0 : index
    %10 = vector.load %arg5[%c0_9, %c0_10] : memref<1x8xf32, #tpu.memory_space<vmem>>, vector<1x8xf32>
    %11 = vector.broadcast %10 : vector<1x8xf32> to vector<8x8xf32>
    %12 = arith.addf %9, %11 : vector<8x8xf32>
    %cst_11 = arith.constant dense<0xFF800000> : vector<8xf32>
    %13 = vector.multi_reduction <maximumf>, %12, %cst_11 [1] : vector<8x8xf32> to vector<8xf32>
    %14 = vector.shape_cast %13 : vector<8xf32> to vector<8x1xf32>
    %15 = vector.broadcast %14 : vector<8x1xf32> to vector<8x8xf32>
    %16 = arith.subf %12, %15 : vector<8x8xf32>
    %17 = math.exp %16 : vector<8x8xf32>
    %cst_12 = arith.constant dense<0.000000e+00> : vector<8xf32>
    %18 = vector.multi_reduction <add>, %17, %cst_12 [1] : vector<8x8xf32> to vector<8xf32>
    %19 = vector.shape_cast %18 : vector<8xf32> to vector<8x1xf32>
    %20 = tpu.reciprocal %19 : vector<8x1xf32> -> vector<8x1xf32>
    %21 = vector.broadcast %20 : vector<8x1xf32> to vector<8x8xf32>
    %22 = arith.mulf %17, %21 : vector<8x8xf32>
    %c0_13 = arith.constant 0 : index
    %c0_14 = arith.constant 0 : index
    %23 = vector.load %arg6[%c0_13, %c0_14] : memref<8x8xf32, #tpu.memory_space<vmem>>, vector<8x8xf32>
    tpu.vector_store %arg6[%c0_13, %c0_14], %22 {strides = array<i32>} : memref<8x8xf32, #tpu.memory_space<vmem>>, vector<8x8xf32>,
    return
  }
  func.func @transform_0(%arg0: i32) -> (i32, i32) {
    %c0_i32 = arith.constant 0 : i32
    %c0_i32_0 = arith.constant 0 : i32
    return %arg0, %c0_i32 : i32, i32
  }
  func.func @transform_1(%arg0: i32) -> (i32, i32) {
    %c0_i32 = arith.constant 0 : i32
    %c0_i32_0 = arith.constant 0 : i32
    %c0_i32_1 = arith.constant 0 : i32
    return %c0_i32, %c0_i32_0 : i32, i32
  }
  func.func @transform_2(%arg0: i32) -> (i32, i32) {
    %c0_i32 = arith.constant 0 : i32
    %c0_i32_0 = arith.constant 0 : i32
    %c0_i32_1 = arith.constant 0 : i32
    return %c0_i32, %c0_i32_0 : i32, i32
  }
  func.func @transform_3(%arg0: i32) -> (i32, i32) {
    %c0_i32 = arith.constant 0 : i32
    %c0_i32_0 = arith.constant 0 : i32
    %c0_i32_1 = arith.constant 0 : i32
    return %c0_i32, %c0_i32_0 : i32, i32
  }
  func.func @transform_4(%arg0: i32) -> (i32, i32) {
    %c0_i32 = arith.constant 0 : i32
    %c0_i32_0 = arith.constant 0 : i32
    %c0_i32_1 = arith.constant 0 : i32
    return %c0_i32, %c0_i32_0 : i32, i32
  }
  func.func @transform_5(%arg0: i32) -> (i32, i32) {
    %c0_i32 = arith.constant 0 : i32
    %c0_i32_0 = arith.constant 0 : i32
    return %arg0, %c0_i32 : i32, i32
  }
}

</mosaic_0001>

<bundles_post_ra>
// kernel: tpu_custom_call.1
= control target key start
LH: loop header
LB: loop body
LE: loop exit
PB: predicated region body
PF: predicated region fallthrough
CT: control target
= control target key end

     0   :  { %vm30_vm0 = vcmask 64512   ;;  %v270_v2 = vmov 0.0   ;;  %vm271_vm1 = vmmov 0   ;;  %s338_s0 = inlined_call_operand.vmem [shape: f32[8,8], index: 0, kind: input, shape index: {}]   ;;  %s339_s1 = inlined_call_operand.vmem [shape: f32[8,16], index: 1, kind: input, shape index: {}]   ;;  %s340_s2 = inlined_call_operand.vmem [shape: f32[1,16], index: 2, kind: input, shape index: {}]   ;;  %s341_s3 = inlined_call_operand.vmem [shape: f32[16,8], index: 3, kind: input, shape index: {}]   ;;  %s342_s4 = inlined_call_operand.vmem [shape: f32[1,8], index: 4, kind: input, shape index: {}]   ;;  %s343_s5 = inlined_call_operand.hbm [shape: f32[8,8], index: 5, kind: output, shape index: {}]  }
   0x1   :  { %v22_v0 = vld [vmem:[%s339_s1] sm:$0xff]  ;;  %223 = vmatprep.subr.mxu0 %v270_v2  ;;  %225 = vmatprep.mubr.msk.f32.mxu0 %vm271_vm1, %v270_v2 }
   0x2   :  { %v21_v1 = vld [vmem:[%s338_s0] sm:$0xff] }
   0x3   :  { %10 = vsyncpa [#allocation3], 0  ;;  %224 = vmatpush3.msra.mxu0 %v22_v0  ;;  %232 = vmatprep.mubr.msk.f32.mxu1 %vm271_vm1, %v270_v2  ;;  %v105_v3 = vld [vmem:[%s341_s3] sm:$0xff]  ;;  %v106_v4 = vld [vmem:[%s341_s3 + $0x8] sm:$0xff]  ;;  %v272_v6 = vmov 0.0|0.0   ;;  %vm114_vm2 = vcmask 130048  }
   0x4   :  { %226 = vmatmul.mubr.msk.f32.vlgmr.msra.gmra.mrb[0].mxu0 %vm30_vm0, %v21_v1  ;;  %v236_v5 = vpack.c.bf16 %v106_v4, %v105_v3  ;;  %235 = vmatprep.subr.bf16.mxu1 %v272_v6  ;;  %v214_v7 = vld [vmem:[%s340_s2] ss:$0 sm:$0xff]  ;;  %s273_s2 = smov [#allocation2]  }
   0x5   :  { %v216_v12 = vld [vmem:[%s342_s4] ss:$0 sm:$0xff]  ;;  %s206_s3 = sshll.u32 %s273_s2, 4  ;;  %s207_s3 = int_to_ptr.vmem [resolvable:$true] %s206_s3 }
   0x6   :  { %237 = vmatpush3.bf16.msra.mxu1 %v236_v5  ;;  %s246_s4 = scalar_lea.vmem %s207_s3, 128  ;;  %p251_p1 = scmp.lt.s32.totalorder %s207_s3, %s207_s3 }
   0x7   :  { %p247_p0 = scmp.ne.s32.totalorder %s207_s3, %s246_s4  ;;  %p252_p2 = scmp.lt.s32.totalorder %s246_s4, %s246_s4 }
   0x9   :  { %p253_p3 = por %p252_p2, %p251_p1 }
   0xb   :  { %p254_p4 = pnand %p253_p3, %p247_p0 }
  0xd7   :  { %v100_v8 = vpop.f32.mrb[0].mxu0 }
  0xd8   :  { %v101_v9 = vadd.f32 %v214_v7, %v100_v8  ;;  %v227_v10 = vpop.f32.mrb[1].mxu0 }
  0xda   :  { %v104_v11 = vmax.f32 %v101_v9, 0.0 }
  0xdc   :  { %233 = vmatmul.mubr.msk.f32.vlgmr.msra.gmra.mrb[0].mxu1 %vm114_vm2, %v104_v11 }
 0x1af   :  { %v184_v13 = vpop.f32.mrb[0].mxu1 }
 0x1b0   :  { %v185_v14 = vadd.f32 %v216_v12, %v184_v13  ;;  %v234_v15 = vpop.f32.mrb[1].mxu1 }
 0x1b2   :  { %v188_v16 = vsel %vm30_vm0, %v185_v14, -inf }
 0x1b3   :  { %189 = vmax.xlane.f32.xlu0 %v188_v16 }
 0x240   :  { %v190_v17 = vpop.xlane.xlu0 %189 }
 0x241   :  { %v191_v18 = vsub.f32 %v185_v14, %v190_v17 }
 0x243   :  { %v192_v19 = vmul.f32 1.442695, %v191_v18 }
 0x245   :  { %242 = vpow2.f32 %v192_v19 }
 0x24f   :  { %v243_v20 = vpop.eup %242 }
 0x250   :  { %v194_v21 = vsel %vm30_vm0, %v243_v20, 0.0 }
 0x251   :  { %195 = vadd.xlane.f32.xlu0 %v194_v21 }
 0x2de   :  { %v196_v22 = vpop.xlane.xlu0 %195 }
 0x2df   :  { %244 = vrcp.f32 %v196_v22 }
 0x2e9   :  { %v245_v23 = vpop.eup %244 }
 0x2ea   :  { %v198_v24 = vmul.f32 %v245_v23, %v243_v20 }
 0x2ec   :  { %199 = vst.msk [vmem:[#allocation2] sm:$0xff] %vm30_vm0, %v198_v24 }
 0x2ed   :  { %257 = shalt.err (!%p254_p4)
}
 0x2ee   :  { %s258_s30 = scalar_lea.hbm %s343_s5, 128 }
 0x2ef   :  { %p259_p5 = scmp.ne.s32.totalorder %s343_s5, %s258_s30  ;;  %p262_p6 = scmp.lt.u32.totalorder %s258_s30, %s343_s5 }
 0x2f1   :  { %p264_p7 = pnand %p262_p6, %p259_p5 }
 0x2f3   :  { %267 = shalt.err (!%p264_p7)
}
 0x2f4   :  { %209 = dma.vmem_to_hbm [thread:$0]  %s207_s3, 128, %s343_s5, [#allocation3]  }
 0x2f5   :  { %268 = dma.done.wait [#allocation3], 128  }
 0x2f6   :  { %269 = vsyncadd [#allocation3], 4294967168 }
 0x2f7   :  { %213 = vsyncpa [#allocation3], 1 }

</bundles_post_ra>
